<compile_context>
chip_gen: v6e
topology: v6e:2x2x1
jax: 0.10.0
libtpu: 0.0.40
codegen_flags: <defaults>
</compile_context>

<pallas_src>
import functools

import jax
import jax.numpy as jnp
from jax import lax
from jax.experimental import pallas as pl
from jax.experimental.pallas import tpu as pltpu

_LOG2E = 1.4426950408889634


def _attn_kernel(x_ref, wqkv_ref, bqkv_ref, wproj_ref, bproj_ref, kbias_ref,
                 o_ref, q_ref, k_ref, v_ref, ocat_ref, *,
                 num_heads: int, q_tile: int, fill_strip: int,
                 masked: bool, bf16_exp: bool):
    # x_ref:     (N, C)      full (padded) sequence of the current batch element
    # wqkv_ref:  (C, 3C)     q-columns already scaled by softmax_scale*log2(e)
    # bqkv_ref:  (1, 3C)     f32 qkv bias (zeros when qkv_bias=False)
    # wproj_ref: (C, C)      output projection
    # bproj_ref: (1, C)
    # kbias_ref: (1, 1, N)   f32 additive key mask (-1e30 on padded keys)
    # o_ref:     (TQ, C)     current query tile of the output
    # q/k/v_ref: (H, N, hd)  VMEM scratch, filled once per batch element
    # ocat_ref:  (TQ, C)     head-concat buffer feeding the projection matmul
    i = pl.program_id(1)
    N, C = x_ref.shape
    H = num_heads
    hd = C // H
    cdtype = q_ref.dtype  # compute (input) dtype for MXU operands

    # ---- per-batch q/k/v projection, computed once (q-tile axis carries it) --
    def _fill(r0, rows):
        xs = x_ref[pl.ds(r0, rows), :]
        qkv = jnp.dot(xs, wqkv_ref[...],
                      preferred_element_type=jnp.float32)       # (rows, 3C) f32
        qkv = (qkv + bqkv_ref[...]).astype(cdtype)              # cast ONCE
        for h in range(H):
            q_ref[h, pl.ds(r0, rows), :] = qkv[:, h * hd:(h + 1) * hd]
            k_ref[h, pl.ds(r0, rows), :] = qkv[:, C + h * hd:C + (h + 1) * hd]
            v_ref[h, pl.ds(r0, rows), :] = qkv[:, 2 * C + h * hd:2 * C + (h + 1) * hd]

    @pl.when(i == 0)
    def _():
        if fill_strip >= N:
            _fill(0, N)
        else:
            def body(s, carry):
                _fill(pl.multiple_of(s * fill_strip, fill_strip), fill_strip)
                return carry
            lax.fori_loop(0, N // fill_strip, body, 0)

    # ---- attention for the current query tile --------------------------------
    q0 = pl.multiple_of(i * q_tile, q_tile)
    q = q_ref[:, pl.ds(q0, q_tile), :]                          # (H, TQ, hd)
    k = k_ref[...]                                              # (H, N,  hd)
    v = v_ref[...]                                              # (H, N,  hd)

    # Head-batched scores, f32 accumulation (scale*log2e already in Wq).
    s = lax.dot_general(q, k, (((2,), (2,)), ((0,), (0,))),
                        preferred_element_type=jnp.float32)     # (H, TQ, N)
    if masked:
        s = s + kbias_ref[...]                                  # mask padded keys

    m = jnp.max(s, axis=-1, keepdims=True)
    if bf16_exp:
        # bf16 EUP path (v6e/v7x); row-sum accumulated in f32.
        p = jnp.exp2((s - m).astype(jnp.bfloat16))
        l = jnp.sum(p, axis=-1, keepdims=True, dtype=jnp.float32)
    else:
        p = jnp.exp2(s - m)
        l = jnp.sum(p, axis=-1, keepdims=True)

    # PV matmul on UNNORMALIZED probabilities; normalize the small result.
    ov = lax.dot_general(p.astype(cdtype), v, (((2,), (1,)), ((0,), (0,))),
                         preferred_element_type=jnp.float32)    # (H, TQ, hd)
    ov = ov * pl.reciprocal(l, approx=True)                     # deferred norm

    # Pack heads into a lane-dense (TQ, C) buffer, then one K=C projection.
    for h in range(H):
        ocat_ref[:, h * hd:(h + 1) * hd] = ov[h].astype(cdtype)
    y = jnp.dot(ocat_ref[...], wproj_ref[...],
                preferred_element_type=jnp.float32)             # (TQ, C) f32
    o_ref[...] = (y + bproj_ref[...].astype(jnp.float32)).astype(o_ref.dtype)


def _vmem_limit_bytes() -> int:
    """Per-generation scoped VMEM limit (~3/4 of physical, capped at 100 MiB)."""
    cap = None
    try:
        info = pltpu.get_tpu_info()
        cap = getattr(info, "vmem_capacity_bytes", None)
    except Exception:
        cap = None
    if not cap:
        cap = 64 * 1024 * 1024  # conservative fallback (v7x-sized)
    return int(min((int(cap) * 3) // 4, 100 * 1024 * 1024))


def _pick_q_tile(n: int, num_heads: int, budget_bytes: int) -> int:
    """Largest MXU-friendly divisor of n whose f32 score temporaries fit."""
    divisors = [t for t in (256, 128, 64, 32, 16, 8) if t <= n and n % t == 0]
    if not divisors:
        return n
    for t in divisors:
        if 3 * num_heads * t * n * 4 <= budget_bytes:  # scores + exp + slack
            return t
    return divisors[-1]


def self_attention(x, w_qkv, w_proj, b_proj, b_qkv=None,
                   *, num_heads=1, qk_scale=None):
    """x: (B, N, C); w_qkv: (C, 3C); w_proj: (C, C); b_proj: (C,); b_qkv: (3C,) or None."""
    B, N, C = x.shape
    assert C % num_heads == 0
    hd = C // num_heads
    scale = qk_scale if qk_scale is not None else hd ** (-0.5)

    # Fold softmax scale * log2(e) into the q projection weights (and q bias).
    qscale = scale * _LOG2E
    scale_vec = jnp.concatenate([jnp.full((C,), qscale, jnp.float32),
                                 jnp.ones((2 * C,), jnp.float32)])
    w_qkv_s = (w_qkv.astype(jnp.float32) * scale_vec[None, :]).astype(w_qkv.dtype)
    if b_qkv is None:
        b_qkv_s = jnp.zeros((1, 3 * C), jnp.float32)
    else:
        b_qkv_s = (b_qkv.astype(jnp.float32) * scale_vec).reshape(1, 3 * C)
    b_proj_2d = b_proj.reshape(1, C)

    # Pad N so every softmax / PV op is lane-dense; mask padded key columns.
    n_orig = N
    if N > 128 and N % 128 != 0:
        n_pad = ((N + 127) // 128) * 128
    elif N % 8 != 0:
        n_pad = ((N + 7) // 8) * 8
    else:
        n_pad = N
    masked = n_pad != n_orig
    if masked:
        x = jnp.pad(x, ((0, 0), (0, n_pad - n_orig), (0, 0)))
    kbias = jnp.zeros((1, 1, n_pad), jnp.float32)
    if masked:
        kbias = kbias.at[:, :, n_orig:].set(-1e30)
    N = n_pad

    vmem_limit = _vmem_limit_bytes()
    q_tile = _pick_q_tile(N, num_heads, vmem_limit // 4)
    n_q = N // q_tile
    # Strip size for the per-batch QKV fill (bounds the f32 (strip,3C) temp).
    fill_strip = 128 if (N > 128 and N % 128 == 0) else N

    # bf16 exp only where the EUP handles bf16 natively (not v5e) and the
    # compute dtype is already bf16.
    try:
        kind = jax.devices()[0].device_kind.lower()
    except Exception:
        kind = ""
    is_v5e = ("v5 lite" in kind) or ("v5e" in kind) or ("v5litepod" in kind)
    bf16_exp = (x.dtype == jnp.bfloat16) and not is_v5e

    kernel = functools.partial(_attn_kernel, num_heads=num_heads, q_tile=q_tile,
                               fill_strip=fill_strip, masked=masked,
                               bf16_exp=bf16_exp)

    out = pl.pallas_call(
        kernel,
        out_shape=jax.ShapeDtypeStruct((B, N, C), x.dtype),
        grid_spec=pltpu.PrefetchScalarGridSpec(
            num_scalar_prefetch=0,
            grid=(B, n_q),
            in_specs=[
                pl.BlockSpec((pl.Squeezed(), N, C), lambda b, i: (b, 0, 0)),
                pl.BlockSpec((C, 3 * C), lambda b, i: (0, 0)),
                pl.BlockSpec((1, 3 * C), lambda b, i: (0, 0)),
                pl.BlockSpec((C, C), lambda b, i: (0, 0)),
                pl.BlockSpec((1, C), lambda b, i: (0, 0)),
                pl.BlockSpec((1, 1, N), lambda b, i: (0, 0, 0)),
            ],
            out_specs=pl.BlockSpec((pl.Squeezed(), q_tile, C),
                                   lambda b, i: (b, i, 0)),
            scratch_shapes=[
                pltpu.VMEM((num_heads, N, hd), x.dtype),   # q cache
                pltpu.VMEM((num_heads, N, hd), x.dtype),   # k cache
                pltpu.VMEM((num_heads, N, hd), x.dtype),   # v cache
                pltpu.VMEM((q_tile, C), x.dtype),          # head-concat buffer
            ],
        ),
        compiler_params=pltpu.CompilerParams(
            # batch axis parallel (megacore); q-tile axis carries q/k/v cache
            dimension_semantics=("parallel", "arbitrary"),
            vmem_limit_bytes=vmem_limit,
        ),
    )(x, w_qkv_s, b_qkv_s, w_proj, b_proj_2d, kbias)

    if masked:
        out = out[:, :n_orig, :]
    return out


def self_attention_ref(x, w_qkv, w_proj, b_proj, b_qkv=None,
                       *, num_heads=1, qk_scale=None):
    """Pure-JAX reference mirroring the PyTorch forward exactly."""
    B, N, C = x.shape
    hd = C // num_heads
    scale = qk_scale if qk_scale is not None else hd ** (-0.5)

    qkv = x @ w_qkv                                            # (B, N, 3C)
    if b_qkv is not None:
        qkv = qkv + b_qkv
    qkv = qkv.reshape(B, N, 3, num_heads, hd).transpose(2, 0, 3, 1, 4)
    q, k, v = qkv[0], qkv[1], qkv[2]                           # (B, H, N, hd)
    attn = (q @ jnp.swapaxes(k, -2, -1)) * scale               # (B, H, N, N)
    attn = jax.nn.softmax(attn, axis=-1)
    out = (attn @ v).transpose(0, 2, 1, 3).reshape(B, N, C)    # (B, N, C)
    return out @ w_proj + b_proj


if __name__ == "__main__":
    key = jax.random.PRNGKey(0)

    # --- Test 1: module defaults (num_heads=1, qkv_bias=False), f32, small ---
    B, N, C = 2, 8, 32
    k1, k2, k3, k4, key = jax.random.split(key, 5)
    x = jax.random.normal(k1, (B, N, C), dtype=jnp.float32)
    w_qkv = jax.random.normal(k2, (C, 3 * C), dtype=jnp.float32) / jnp.sqrt(C)
    w_proj = jax.random.normal(k3, (C, C), dtype=jnp.float32) / jnp.sqrt(C)
    b_proj = jax.random.normal(k4, (C,), dtype=jnp.float32) * 0.01

    out1 = jax.block_until_ready(
        self_attention(x, w_qkv, w_proj, b_proj, num_heads=1))
    ref1 = self_attention_ref(x, w_qkv, w_proj, b_proj, num_heads=1)
    assert out1.shape == (B, N, C)
    assert jnp.allclose(out1, ref1, atol=1e-2, rtol=1e-2), "test1 mismatch"

    # --- Test 2: multi-head, qkv bias, bf16 operands, strip-filled QKV -------
    B2, N2, C2, H2 = 2, 256, 64, 4
    k1, k2, k3, k4, k5, key = jax.random.split(key, 6)
    x2 = jax.random.normal(k1, (B2, N2, C2), dtype=jnp.float32)
    wq2 = jax.random.normal(k2, (C2, 3 * C2), dtype=jnp.float32) / jnp.sqrt(C2)
    wp2 = jax.random.normal(k3, (C2, C2), dtype=jnp.float32) / jnp.sqrt(C2)
    bp2 = jax.random.normal(k4, (C2,), dtype=jnp.float32) * 0.01
    bq2 = jax.random.normal(k5, (3 * C2,), dtype=jnp.float32) * 0.01

    out2 = jax.block_until_ready(
        self_attention(x2.astype(jnp.bfloat16), wq2.astype(jnp.bfloat16),
                       wp2.astype(jnp.bfloat16), bp2.astype(jnp.bfloat16),
                       bq2.astype(jnp.bfloat16), num_heads=H2))
    ref2 = self_attention_ref(x2, wq2, wp2, bp2, bq2, num_heads=H2)
    assert out2.shape == (B2, N2, C2)
    assert jnp.allclose(out2.astype(jnp.float32), ref2, atol=5e-2, rtol=5e-2), \
        "test2 mismatch"

    # --- Test 3: non-128-aligned ViT sequence length (N=197) -> pad + mask ---
    B3, N3, C3, H3 = 2, 197, 64, 4
    k1, k2, k3, k4, k5, key = jax.random.split(key, 6)
    x3 = jax.random.normal(k1, (B3, N3, C3), dtype=jnp.float32)
    wq3 = jax.random.normal(k2, (C3, 3 * C3), dtype=jnp.float32) / jnp.sqrt(C3)
    wp3 = jax.random.normal(k3, (C3, C3), dtype=jnp.float32) / jnp.sqrt(C3)
    bp3 = jax.random.normal(k4, (C3,), dtype=jnp.float32) * 0.01
    bq3 = jax.random.normal(k5, (3 * C3,), dtype=jnp.float32) * 0.01

    out3 = jax.block_until_ready(
        self_attention(x3, wq3, wp3, bp3, bq3, num_heads=H3))
    ref3 = self_attention_ref(x3, wq3, wp3, bp3, bq3, num_heads=H3)
    assert out3.shape == (B3, N3, C3)
    assert jnp.allclose(out3, ref3, atol=2e-2, rtol=2e-2), "test3 mismatch"

    print("KERNEL_OK")
</pallas_src>

<mosaic_0001>
module attributes {stable_mosaic.version = 11 : i64} {
  func.func @_attn_kernel(%arg0: i32, %arg1: i32, %arg2: memref<1x8x32xf32, #tpu.memory_space<vmem>>, %arg3: memref<32x96xf32, #tpu.memory_space<vmem>>, %arg4: memref<1x96xf32, #tpu.memory_space<vmem>>, %arg5: memref<32x32xf32, #tpu.memory_space<vmem>>, %arg6: memref<1x32xf32, #tpu.memory_space<vmem>>, %arg7: memref<1x1x8xf32, #tpu.memory_space<vmem>>, %arg8: memref<1x8x32xf32, #tpu.memory_space<vmem>>, %arg9: memref<1x8x32xf32, #tpu.memory_space<vmem>>, %arg10: memref<1x8x32xf32, #tpu.memory_space<vmem>>, %arg11: memref<1x8x32xf32, #tpu.memory_space<vmem>>, %arg12: memref<8x32xf32, #tpu.memory_space<vmem>>) attributes {dimension_semantics = [#tpu.dimension_semantics<parallel>, #tpu.dimension_semantics<arbitrary>], iteration_bounds = array<i64: 2, 1>, scalar_prefetch = 0 : i64, scratch_operands = 4 : i64, tpu.core_type = #tpu.core_type<tc>, window_params = [{transform_indices = @transform_0, window_bounds = array<i64: 1, 8, 32>}, {pipeline_mode = #tpu.pipeline_mode<synchronous>, transform_indices = @transform_1, window_bounds = array<i64: 32, 96>}, {pipeline_mode = #tpu.pipeline_mode<synchronous>, transform_indices = @transform_2, window_bounds = array<i64: 1, 96>}, {pipeline_mode = #tpu.pipeline_mode<synchronous>, transform_indices = @transform_3, window_bounds = array<i64: 32, 32>}, {pipeline_mode = #tpu.pipeline_mode<synchronous>, transform_indices = @transform_4, window_bounds = array<i64: 1, 32>}, {pipeline_mode = #tpu.pipeline_mode<synchronous>, transform_indices = @transform_5, window_bounds = array<i64: 1, 1, 8>}, {transform_indices = @transform_6, window_bounds = array<i64: 1, 8, 32>}]} {
    %c0_i32 = arith.constant 0 : i32
    %0 = arith.cmpi eq, %arg1, %c0_i32 : i32
    %1 = arith.extui %0 : i1 to i32
    %c0_i32_0 = arith.constant 0 : i32
    %2 = arith.cmpi ne, %1, %c0_i32_0 : i32
    scf.if %2 {
      %c0_23 = arith.constant 0 : index
      %c0_24 = arith.constant 0 : index
      %c0_25 = arith.constant 0 : index
      %32 = vector.load %arg2[%c0_23, %c0_24, %c0_25] : memref<1x8x32xf32, #tpu.memory_space<vmem>>, vector<1x8x32xf32>
      %33 = vector.shape_cast %32 : vector<1x8x32xf32> to vector<8x32xf32>
      %c0_26 = arith.constant 0 : index
      %c0_27 = arith.constant 0 : index
      %34 = vector.load %arg3[%c0_26, %c0_27] : memref<32x96xf32, #tpu.memory_space<vmem>>, vector<32x96xf32>
      %cst_28 = arith.constant dense<0.000000e+00> : vector<8x96xf32>
      %35 = tpu.matmul %33, %34, %cst_28 {dimension_numbers = #tpu.dot_dimension_numbers<[1], [0], [0], [1], [0, 0, 1, 1], [], []>} : vector<8x32xf32>, vector<32x96xf32>, vector<8x96xf32> -> vector<8x96xf32>
      %c0_29 = arith.constant 0 : index
      %c0_30 = arith.constant 0 : index
      %36 = vector.load %arg4[%c0_29, %c0_30] : memref<1x96xf32, #tpu.memory_space<vmem>>, vector<1x96xf32>
      %37 = vector.broadcast %36 : vector<1x96xf32> to vector<8x96xf32>
      %38 = arith.addf %35, %37 : vector<8x96xf32>
      %39 = vector.extract_strided_slice %38 {offsets = [0, 0], sizes = [8, 32], strides = [1, 1]} : vector<8x96xf32> to vector<8x32xf32>
      %c0_31 = arith.constant 0 : index
      %c0_32 = arith.constant 0 : index
      %c0_33 = arith.constant 0 : index
      %40 = vector.load %arg9[%c0_31, %c0_32, %c0_33] : memref<1x8x32xf32, #tpu.memory_space<vmem>>, vector<1x8x32xf32>
      %41 = vector.shape_cast %40 : vector<1x8x32xf32> to vector<8x32xf32>
      %42 = vector.shape_cast %39 : vector<8x32xf32> to vector<1x8x32xf32>
      tpu.vector_store %arg9[%c0_31, %c0_32, %c0_33], %42 {strides = array<i32>} : memref<1x8x32xf32, #tpu.memory_space<vmem>>, vector<1x8x32xf32>,
      %43 = vector.extract_strided_slice %38 {offsets = [0, 32], sizes = [8, 32], strides = [1, 1]} : vector<8x96xf32> to vector<8x32xf32>
      %c0_34 = arith.constant 0 : index
      %c0_35 = arith.constant 0 : index
      %c0_36 = arith.constant 0 : index
      %44 = vector.load %arg10[%c0_34, %c0_35, %c0_36] : memref<1x8x32xf32, #tpu.memory_space<vmem>>, vector<1x8x32xf32>
      %45 = vector.shape_cast %44 : vector<1x8x32xf32> to vector<8x32xf32>
      %46 = vector.shape_cast %43 : vector<8x32xf32> to vector<1x8x32xf32>
      tpu.vector_store %arg10[%c0_34, %c0_35, %c0_36], %46 {strides = array<i32>} : memref<1x8x32xf32, #tpu.memory_space<vmem>>, vector<1x8x32xf32>,
      %47 = vector.extract_strided_slice %38 {offsets = [0, 64], sizes = [8, 32], strides = [1, 1]} : vector<8x96xf32> to vector<8x32xf32>
      %c0_37 = arith.constant 0 : index
      %c0_38 = arith.constant 0 : index
      %c0_39 = arith.constant 0 : index
      %48 = vector.load %arg11[%c0_37, %c0_38, %c0_39] : memref<1x8x32xf32, #tpu.memory_space<vmem>>, vector<1x8x32xf32>
      %49 = vector.shape_cast %48 : vector<1x8x32xf32> to vector<8x32xf32>
      %50 = vector.shape_cast %47 : vector<8x32xf32> to vector<1x8x32xf32>
      tpu.vector_store %arg11[%c0_37, %c0_38, %c0_39], %50 {strides = array<i32>} : memref<1x8x32xf32, #tpu.memory_space<vmem>>, vector<1x8x32xf32>,
    } else {
    }
    %c8_i32 = arith.constant 8 : i32
    %3 = arith.muli %arg1, %c8_i32 : i32
    %4 = tpu.assume_multiple %3, 8 : i32
    %c0 = arith.constant 0 : index
    %5 = arith.index_cast %4 : i32 to index
    %c0_1 = arith.constant 0 : index
    %6 = vector.load %arg9[%c0, %5, %c0_1] : memref<1x8x32xf32, #tpu.memory_space<vmem>>, vector<1x8x32xf32>
    %c0_2 = arith.constant 0 : index
    %c0_3 = arith.constant 0 : index
    %c0_4 = arith.constant 0 : index
    %7 = vector.load %arg10[%c0_2, %c0_3, %c0_4] : memref<1x8x32xf32, #tpu.memory_space<vmem>>, vector<1x8x32xf32>
    %c0_5 = arith.constant 0 : index
    %c0_6 = arith.constant 0 : index
    %c0_7 = arith.constant 0 : index
    %8 = vector.load %arg11[%c0_5, %c0_6, %c0_7] : memref<1x8x32xf32, #tpu.memory_space<vmem>>, vector<1x8x32xf32>
    %cst = arith.constant dense<0.000000e+00> : vector<1x8x8xf32>
    %9 = tpu.matmul %6, %7, %cst {dimension_numbers = #tpu.dot_dimension_numbers<[2], [2], [1], [1], [0, 0, 0, 1, 1, 1], [0], [0]>} : vector<1x8x32xf32>, vector<1x8x32xf32>, vector<1x8x8xf32> -> vector<1x8x8xf32>
    %cst_8 = arith.constant dense<0xFF800000> : vector<1x8xf32>
    %10 = vector.multi_reduction <maximumf>, %9, %cst_8 [2] : vector<1x8x8xf32> to vector<1x8xf32>
    %11 = vector.shape_cast %10 : vector<1x8xf32> to vector<1x8x1xf32>
    %12 = vector.broadcast %11 : vector<1x8x1xf32> to vector<1x8x8xf32>
    %13 = arith.subf %9, %12 : vector<1x8x8xf32>
    %14 = math.exp2 %13 : vector<1x8x8xf32>
    %cst_9 = arith.constant dense<0.000000e+00> : vector<1x8xf32>
    %15 = vector.multi_reduction <add>, %14, %cst_9 [2] : vector<1x8x8xf32> to vector<1x8xf32>
    %16 = vector.shape_cast %15 : vector<1x8xf32> to vector<1x8x1xf32>
    %cst_10 = arith.constant dense<0.000000e+00> : vector<1x8x32xf32>
    %17 = tpu.matmul %14, %8, %cst_10 {dimension_numbers = #tpu.dot_dimension_numbers<[2], [1], [1], [2], [0, 0, 0, 1, 1, 2], [0], [0]>} : vector<1x8x8xf32>, vector<1x8x32xf32>, vector<1x8x32xf32> -> vector<1x8x32xf32>
    %18 = tpu.reciprocal %16 {approx = true} : vector<1x8x1xf32> -> vector<1x8x1xf32>
    %19 = vector.broadcast %18 : vector<1x8x1xf32> to vector<1x8x32xf32>
    %20 = arith.mulf %17, %19 : vector<1x8x32xf32>
    %21 = vector.shape_cast %20 : vector<1x8x32xf32> to vector<8x32xf32>
    %c0_11 = arith.constant 0 : index
    %c0_12 = arith.constant 0 : index
    %22 = vector.load %arg12[%c0_11, %c0_12] : memref<8x32xf32, #tpu.memory_space<vmem>>, vector<8x32xf32>
    tpu.vector_store %arg12[%c0_11, %c0_12], %21 {strides = array<i32>} : memref<8x32xf32, #tpu.memory_space<vmem>>, vector<8x32xf32>,
    %c0_13 = arith.constant 0 : index
    %c0_14 = arith.constant 0 : index
    %23 = vector.load %arg12[%c0_13, %c0_14] : memref<8x32xf32, #tpu.memory_space<vmem>>, vector<8x32xf32>
    %c0_15 = arith.constant 0 : index
    %c0_16 = arith.constant 0 : index
    %24 = vector.load %arg5[%c0_15, %c0_16] : memref<32x32xf32, #tpu.memory_space<vmem>>, vector<32x32xf32>
    %cst_17 = arith.constant dense<0.000000e+00> : vector<8x32xf32>
    %25 = tpu.matmul %23, %24, %cst_17 {dimension_numbers = #tpu.dot_dimension_numbers<[1], [0], [0], [1], [0, 0, 1, 1], [], []>} : vector<8x32xf32>, vector<32x32xf32>, vector<8x32xf32> -> vector<8x32xf32>
    %c0_18 = arith.constant 0 : index
    %c0_19 = arith.constant 0 : index
    %26 = vector.load %arg6[%c0_18, %c0_19] : memref<1x32xf32, #tpu.memory_space<vmem>>, vector<1x32xf32>
    %27 = vector.broadcast %26 : vector<1x32xf32> to vector<8x32xf32>
    %28 = arith.addf %25, %27 : vector<8x32xf32>
    %c0_20 = arith.constant 0 : index
    %c0_21 = arith.constant 0 : index
    %c0_22 = arith.constant 0 : index
    %29 = vector.load %arg8[%c0_20, %c0_21, %c0_22] : memref<1x8x32xf32, #tpu.memory_space<vmem>>, vector<1x8x32xf32>
    %30 = vector.shape_cast %29 : vector<1x8x32xf32> to vector<8x32xf32>
    %31 = vector.shape_cast %28 : vector<8x32xf32> to vector<1x8x32xf32>
    tpu.vector_store %arg8[%c0_20, %c0_21, %c0_22], %31 {strides = array<i32>} : memref<1x8x32xf32, #tpu.memory_space<vmem>>, vector<1x8x32xf32>,
    return
  }
  func.func @transform_0(%arg0: i32, %arg1: i32) -> (i32, i32, i32) {
    %c0_i32 = arith.constant 0 : i32
    %c0_i32_0 = arith.constant 0 : i32
    %c0_i32_1 = arith.constant 0 : i32
    return %arg0, %c0_i32, %c0_i32_0 : i32, i32, i32
  }
  func.func @transform_1(%arg0: i32, %arg1: i32) -> (i32, i32) {
    %c0_i32 = arith.constant 0 : i32
    %c0_i32_0 = arith.constant 0 : i32
    %c0_i32_1 = arith.constant 0 : i32
    return %c0_i32, %c0_i32_0 : i32, i32
  }
  func.func @transform_2(%arg0: i32, %arg1: i32) -> (i32, i32) {
    %c0_i32 = arith.constant 0 : i32
    %c0_i32_0 = arith.constant 0 : i32
    %c0_i32_1 = arith.constant 0 : i32
    return %c0_i32, %c0_i32_0 : i32, i32
  }
  func.func @transform_3(%arg0: i32, %arg1: i32) -> (i32, i32) {
    %c0_i32 = arith.constant 0 : i32
    %c0_i32_0 = arith.constant 0 : i32
    %c0_i32_1 = arith.constant 0 : i32
    return %c0_i32, %c0_i32_0 : i32, i32
  }
  func.func @transform_4(%arg0: i32, %arg1: i32) -> (i32, i32) {
    %c0_i32 = arith.constant 0 : i32
    %c0_i32_0 = arith.constant 0 : i32
    %c0_i32_1 = arith.constant 0 : i32
    return %c0_i32, %c0_i32_0 : i32, i32
  }
  func.func @transform_5(%arg0: i32, %arg1: i32) -> (i32, i32, i32) {
    %c0_i32 = arith.constant 0 : i32
    %c0_i32_0 = arith.constant 0 : i32
    %c0_i32_1 = arith.constant 0 : i32
    %c0_i32_2 = arith.constant 0 : i32
    return %c0_i32, %c0_i32_0, %c0_i32_1 : i32, i32, i32
  }
  func.func @transform_6(%arg0: i32, %arg1: i32) -> (i32, i32, i32) {
    %c0_i32 = arith.constant 0 : i32
    %c0_i32_0 = arith.constant 0 : i32
    return %arg0, %arg1, %c0_i32 : i32, i32, i32
  }
}

</mosaic_0001>

<bundles_post_ra>
// kernel: tpu_custom_call.1
= control target key start
LH: loop header
LB: loop body
LE: loop exit
PB: predicated region body
PF: predicated region fallthrough
CT: control target
= control target key end

     0   :  { %s1369_s0 = inlined_call_operand.hbm [shape: f32[2,8,32], index: 0, kind: input, shape index: {}]   ;;  %s1370_s1 = inlined_call_operand.hbm [shape: f32[32,96], index: 1, kind: input, shape index: {}]   ;;  %s1371_s2 = inlined_call_operand.vmem [shape: f32[1,96], index: 2, kind: input, shape index: {}]   ;;  %s1372_s3 = inlined_call_operand.hbm [shape: f32[32,32], index: 3, kind: input, shape index: {}]   ;;  %s1373_s4 = inlined_call_operand.vmem [shape: f32[1,32], index: 4, kind: input, shape index: {}]   ;;  %s1374_s5 = inlined_call_operand.vmem [shape: f32[1,1,8], index: 5, kind: input, shape index: {}]   ;;  %s1375_s6 = inlined_call_operand.hbm [shape: f32[2,8,32], index: 6, kind: output, shape index: {}]  }
   0x1   :  { %1379 = sst [smem:[#allocation16_spill]] %s1370_s1 }
   0x2   :  { %11 = vsyncpa [#allocation7], 0 }
   0x3   :  { %13 = vsyncpa [#allocation7 + $0x1], 0 }
   0x4   :  { %14 = vsyncpa [#allocation10], 0 }
   0x5   :  { %15 = vsyncpa [#allocation8], 0 }
   0x6   :  { %17 = vsyncpa [#allocation8 + $0x1], 0  ;;  %s1152_s21 = smov 0   ;;  %s1154_s22 = smov 0  }
   0x7   :  { %s1156_s23 = smov 0   ;;  %s1158_s24 = smov 0  }
   0x8   :  { %s1160_s25 = smov 0   ;;  %s1162_s26 = smov 0  }
   0x9 LB: > { %s778_s5 = sadd.s32 4294967295, %s1105_s26   ;;  %s779_s27 = sadd.s32 4294967294, %s1105_s26   ;;  %s1105_s26 = sphi %s1162_s26, %s23_s26   ;;  %s1101_s25 = sphi %s1160_s25, %s1397_s25   ;;  %s1097_s24 = sphi %s1158_s24, %s1396_s24   ;;  %s1093_s23 = sphi %s1156_s23, %s1395_s23   ;;  %s1089_s22 = sphi %s1154_s22, %s1394_s22   ;;  %s1085_s21 = sphi %s1152_s21, %s1393_s21  }
   0xa   : > { %p55_p0 = scmp.ne.s32.totalorder %s1089_s22, %s1085_s21  ;;  %p1186_p1 = scmp.eq.s32.totalorder %s778_s5, 0 }
   0xb   : > { %p1190_p2 = scmp.eq.s32.totalorder %s778_s5, 1  ;;  %p192_p3 = scmp.eq.s32.totalorder %s779_s27, 1 }
   0xc   : > { %s1380_s28 = scalar_select %p1186_p1, 1, 0 }
   0xd   : > { %p1196_p4 = por %p1186_p1, %p55_p0  ;;  %p780_p5 = scmp.ge.s32.totalorder %s1105_s26, 1 }
   0xe   : > { %p1201_p6 = por %p192_p3, %p55_p0  ;;  %p199_p7 = scmp.lt.s32.totalorder %s1105_s26, 3 }
   0xf   : > { %s1382_s30 = scalar_select %p1196_p4, 1, 0 }
  0x10   : > { %s1383_s7 = scalar_select %p1201_p6, 1, 0 }
  0x11   : > { %p1206_p8 = pnand %p780_p5, %p199_p7  ;;  %s1107_s9 = smov [#allocation9]  }
  0x12   : > { %s211_s10 = sshll.u32 %s1107_s9, 4  ;;  %s1108_s12 = smov [#allocation11]   ;;  %s212_s10 = int_to_ptr.vmem [resolvable:$true] %s211_s10 }
  0x13   : > { %p860_p9 = pneg %p1206_p8  ;;  %s227_s13 = sshll.u32 %s1108_s12, 4  ;;  %s228_s13 = int_to_ptr.vmem [resolvable:$true] %s227_s13 }
  0x14   : > { %s952_s14 = scalar_lea.vmem %s212_s10, 512  ;;  %p960_p5 = scmp.lt.s32.totalorder %s212_s10, %s212_s10 }
  0x15   : > { %p1215_p11 = pnand %p860_p9, %p1186_p1  ;;  %p953_p13 = scmp.ne.s32.totalorder %s212_s10, %s952_s14 }
  0x16   : > { %p961_p7 = scmp.lt.s32.totalorder %s952_s14, %s952_s14 }
  0x17   : > { %p943_p12 = pneg %p1215_p11 }
  0x18   : > { %p962_p10 = por %p961_p7, %p960_p5 }
  0x19   : > { %p955_p0 = pnand %p953_p13, %p943_p12 }
  0x1b   : > { %p956_p3 = pneg %p955_p0 }
  0x1d   : > { %p963_p9 = pnand %p962_p10, %p956_p3 }
  0x1f   : > { %966 = shalt.err (!%p963_p9)
}
  0x20   : > { %s1109_s15 = smov 128   ;;  %s1110_s16 = smov 8  }
  0x21   : > { %s1386_s1 = sld [smem:[#allocation16_spill]]  ;;  %s978_s19 = scalar_lea.vmem %s228_s13, 512 }
  0x22   : > { %p979_p6 = scmp.ne.s32.totalorder %s228_s13, %s978_s19  ;;  %p986_p1 = scmp.lt.s32.totalorder %s228_s13, %s228_s13 }
  0x23   : > { %p987_p4 = scmp.lt.s32.totalorder %s978_s19, %s978_s19 }
  0x24   : > { %p981_p13 = pnand %p979_p6, %p943_p12 }
  0x25   : > { %p988_p5 = por %p987_p4, %p986_p1 }
  0x26   : > { %p982_p0 = pneg %p981_p13 }
  0x27   : > { %863 = dma.hbm_to_vmem [thread:$0]  (!%p1215_p11), %s1386_s1, 512, %s212_s10, [#allocation10], %s1109_s15, %s1109_s15, %s1110_s16  }
  0x28   : > { %p989_p10 = pnand %p988_p5, %p982_p0 }
  0x2a   : > { %992 = shalt.err (!%p989_p10)
}
  0x2b   : > { %866 = dma.hbm_to_vmem [thread:$0]  (!%p1215_p11), %s1372_s3, 512, %s228_s13, [#allocation10], %s1109_s15, %s1109_s15, %s1110_s16  }
  0x2c   : > { %s35_s27 = sadd.s32 1, %s1101_s25  ;;  %s42_s9 = sadd.s32 1, %s1093_s23 }
  0x2d   : > { %p37_p1 = scmp.ge.s32.totalorder %s35_s27, 2  ;;  %p49_p4 = scmp.ne.s32.totalorder %s1093_s23, %s1089_s22 }
  0x2e   : > { %p50_p6 = scmp.eq.s32.totalorder %s1105_s26, 0  ;;  %p877_p12 = scmp.lt.s32.totalorder %s1105_s26, 2 }
  0x2f   : > { %s1399_s27 = smov (%p37_p1, %s35_s27), 0  ;;  %p1247_p7 = por %p1190_p2, %p49_p4 }
  0x30   : > { %p51_p3 = por %p50_p6, %p49_p4  ;;  %s39_s11 = ssub.s32 %s1101_s25, %s1399_s27 }
  0x31   : > { %s247_s12 = sand.u32 1, %s1093_s23   ;;  %p40_p9 = scmp.eq.s32.totalorder %s39_s11, 0 }
  0x32   : > { %s784_s13 = sshll.u32 %s247_s12, 3  ;;  %s785_s14 = sshll.u32 %s1101_s25, 7 }
  0x33   : > { %s1256_s15 = scalar_select %p40_p9, %s1093_s23, %s42_s9  }
  0x34   : > { %s256_s18 = scalar_lea.hbm %s1369_s0, %s785_s14  ;;  %s251_s19 = scalar_lea.vmem [#allocation6], %s784_s13 }
  0x35   : > { %s258_s20 = sshll.u32 %s251_s19, 4  ;;  %p1263_p11 = pnand %p877_p12, %p51_p3  ;;  %s259_s20 = int_to_ptr.vmem [resolvable:$true] %s258_s20 }
  0x36   : > { %s248_s5 = scalar_lea.sflag [#allocation7], %s247_s12  ;;  %s1006_s11 = scalar_lea.vmem %s259_s20, 128 }
  0x37   : > { %p995_p2 = pneg %p1263_p11  ;;  %p1007_p13 = scmp.ne.s32.totalorder %s259_s20, %s1006_s11 }
  0x38   : > { %s1111_s9 = smov [#allocation6]  }
  0x39   : > { %p1009_p0 = pnand %p1007_p13, %p995_p2  ;;  %s1011_s1 = sshll.u32 %s1111_s9, 4  ;;  %s1012_s1 = int_to_ptr.vmem [resolvable:$false] %s1011_s1 }
  0x3a   : > { %s1013_s14 = scalar_lea.vmem %s1012_s1, 256  ;;  %p1014_p10 = scmp.lt.s32.totalorder %s259_s20, %s1012_s1 }
  0x3b   : > { %p1010_p5 = pneg %p1009_p0  ;;  %p1015_p1 = scmp.lt.s32.totalorder %s1013_s14, %s1006_s11 }
  0x3d   : > { %p1016_p4 = por %p1015_p1, %p1014_p10 }
  0x3f   : > { %p1017_p6 = pnand %p1016_p4, %p1010_p5 }
  0x41   : > { %1020 = shalt.err (!%p1017_p6)
}
  0x42   : > { %870 = dma.hbm_to_vmem [thread:$0]  (!%p1263_p11), %s256_s18, 128, %s259_s20, %s248_s5  }
  0x43   : > { %267 = sbr.rel (%p1206_p8) target bundleno = 1166 (0x48e), region = 44  ;;  %s1274_s12 = sand.u32 (!%p1206_p8), 1, %s1089_s22  }
  0x44   : > { %s787_s13 = sshll.u32 (!%p1206_p8), %s1274_s12, 3  ;;  %s270_s16 = scalar_lea.sflag (!%p1206_p8), [#allocation7], %s1274_s12 }
  0x45   : > { %s273_s1 = scalar_lea.vmem (!%p1206_p8), [#allocation6], %s787_s13  ;;  %p1389_p12 = scmp.ne.s32.totalorder (!%p1206_p8), %s1382_s30, 0 }
  0x48   : > { %1072 = dma.done.wait (%p1389_p12), %s270_s16, 128  }
  0x49   : > { %1074 = vsyncadd (%p1389_p12), %s270_s16, 4294967168  ;;  %p1390_p3 = scmp.ne.s32.totalorder %s1380_s28, 0 }
  0x4b   : > { %1076 = dma.done.wait (%p1390_p3), [#allocation10], 1024  }
  0x4c   : > { %1078 = vsyncadd (%p1390_p3), [#allocation10], 4294966272  ;;  %v1112_v0 = vmov 0.0   ;;  %vm1113_vm0 = vmmov 0   ;;  %v318_v1 = vld [vmem:[#allocation9 + $0x18] sm:$0xff]  ;;  %v317_v2 = vld [vmem:[#allocation9 + $0x10] sm:$0xff] }
  0x4d   : > { %816 = vmatprep.subr.mxu0 %v1112_v0  ;;  %824 = vmatprep.mubr.msk.f32.mxu0 %vm1113_vm0, %v1112_v0  ;;  %v316_v3 = vld [vmem:[#allocation9 + $0x8] sm:$0xff]  ;;  %v315_v4 = vld [vmem:[#allocation9] sm:$0xff]  ;;  %v314_v5 = vld [vmem:[%s273_s1] sm:$0xff]  ;;  %vm326_vm1 = vcmask 261120   ;;  %s1114_s8 = smov 64   ;;  %s1115_s17 = smov 96  }
  0x4e   : > { %827 = vmatprep.subr.mxu1 %v1112_v0  ;;  %829 = vmatprep.mubr.msk.f32.mxu1 %vm1113_vm0, %v1112_v0  ;;  %v791_v6 = vld [vmem:[%s1371_s2] ss:$0 sm:$0xff]  ;;  %vm492_vm2 = vcmask 64512   ;;  %v581_v22 = vld [vmem:[#allocation11 + $0x18] sm:$0xff]  ;;  %v579_v24 = vld [vmem:[#allocation11 + $0x8] sm:$0xff]  ;;  %s799_s20 = sshll.u32 %s1097_s24, 7 }
  0x4f   : > { %817 = vmatpush3.msra.mxu0 %v318_v1  ;;  %v580_v23 = vld [vmem:[#allocation11 + $0x10] sm:$0xff]  ;;  %v578_v25 = vld [vmem:[#allocation11] sm:$0xff]  ;;  %s309_s29 = scalar_lea.vmem [#allocation12], %s787_s13  ;;  %s1326_s14 = scalar_lea.hbm %s1375_s6, %s799_s20 }
  0x50   : > { %818 = vmatprep.subr.mxu0 %v1112_v0  ;;  %v796_v32 = vld [vmem:[%s1373_s4] ss:$0 sm:$0xff]  ;;  %s678_s5 = sshll.u32 %s309_s29, 4  ;;  %s664_s16 = scalar_lea.sflag [#allocation8], %s1274_s12  ;;  %s679_s5 = int_to_ptr.vmem [resolvable:$true] %s678_s5 }
  0x51   : > { %819 = vmatpush3.msra.mxu0 %v317_v2  ;;  %s1021_s1 = scalar_lea.vmem %s679_s5, 128  ;;  %s1116_s24 = smov [#allocation12]  }
  0x52   : > { %820 = vmatprep.subr.mxu0 %v1112_v0  ;;  %p1022_p8 = scmp.ne.s32.totalorder %s679_s5, %s1021_s1  ;;  %s1025_s13 = sshll.u32 %s1116_s24, 4  ;;  %s1026_s13 = int_to_ptr.vmem [resolvable:$false] %s1025_s13 }
  0x53   : > { %821 = vmatpush3.msra.mxu0 %v316_v3  ;;  %s1027_s28 = scalar_lea.vmem %s1026_s13, 256  ;;  %p1028_p2 = scmp.lt.s32.totalorder %s679_s5, %s1026_s13 }
  0x54   : > { %822 = vmatprep.subr.mxu0 %v1112_v0  ;;  %p1023_p9 = pnand %p1022_p8, %p1247_p7  ;;  %p1029_p13 = scmp.lt.s32.totalorder %s1027_s28, %s1021_s1 }
  0x55   : > { %823 = vmatpush3.msra.mxu0 %v315_v4 }
  0x56   : > { %825 = vmatmul.mubr.msk.f32.vlgmr.msra.gmra.mxu0 %vm326_vm1, %v314_v5  ;;  %837 = vmatprep.subr.mxu0 %v1112_v0  ;;  %p1024_p11 = pneg %p1023_p9  ;;  %p1030_p0 = por %p1029_p13, %p1028_p2 }
  0x57   : > { %845 = vmatprep.mubr.msk.f32.mxu0 %vm1113_vm0, %v1112_v0  ;;  %838 = vmatpush3.msra.mxu0 %v581_v22 }
  0x58   : > { %839 = vmatprep.subr.mxu0 %v1112_v0  ;;  %p1031_p5 = pnand %p1030_p0, %p1024_p11 }
  0x59   : > { %840 = vmatpush3.msra.mxu0 %v580_v23 }
  0x5a   : > { %841 = vmatprep.subr.mxu0 %v1112_v0 }
  0x5b   : > { %842 = vmatpush3.msra.mxu0 %v579_v24 }
  0x5c   : > { %843 = vmatprep.subr.mxu0 %v1112_v0 }
  0x5d   : > { %844 = vmatpush3.msra.mxu0 %v578_v25 }
 0x116   : > { %v396_v7 = vpop.f32.mrf.mxu0 }
 0x117   : > { %v397_v8 = vadd.f32 %v791_v6, %v396_v7 }
 0x118   : > { %v826_v9 = vpop.f32.mrf.mxu0 }
 0x119   : > { %400 = vst.msk [vmem:[#allocation2] sm:$0xff] %vm326_vm1, %v397_v8  ;;  %406 = vrot.lane.b32.xlu1 %v397_v8, %s1114_s8  ;;  %402 = vrot.lane.b32.xlu0 %v397_v8, %s1115_s17 }
 0x120   : > { %v412_v13 = vld [vmem:[#allocation2] sm:$0xff] }
 0x18b   : > { %v407_v10 = vpop.permute.xlu1 %406  ;;  %v403_v11 = vpop.permute.xlu0 %402 }
 0x18c   : > { %409 = vst.msk [vmem:[#allocation4] sm:$0xff] %vm326_vm1, %v407_v10  ;;  %405 = vst.msk [vmem:[#allocation3] sm:$0xff] %vm326_vm1, %v403_v11 }
 0x193   : > { %v413_v12 = vld [vmem:[#allocation3] sm:$0xff]  ;;  %v414_v14 = vld [vmem:[#allocation4] sm:$0xff] }
 0x194   : > { %828 = vmatpush3.xpose.msk.msra.mxu1 %vm326_vm1, %v413_v12 }
 0x195   : > { %832 = vmatprep.subr.mxu1 %v1112_v0 }
 0x197   : > { %830 = vmatmul.mubr.msk.f32.vlgmr.msra.gmra.mxu1 %vm326_vm1, %v412_v13 }
 0x198   : > { %833 = vmatpush3.msra.mxu1 %v414_v14  ;;  %834 = vmatprep.mubr.msk.f32.mxu1 %vm1113_vm0, %v1112_v0 }
 0x257   : > { %v488_v15 = vpop.f32.mrf.mxu1 }
 0x258   : > { %v493_v16 = vsel %vm492_vm2, %v488_v15, -inf }
 0x259   : > { %494 = vmax.xlane.f32.xlu0 %v493_v16  ;;  %v831_v17 = vpop.f32.mrf.mxu1 }
 0x2e2   : > { %v495_v18 = vpop.xlane.xlu0 %494 }
 0x2e3   : > { %v496_v19 = vsub.f32 %v488_v15, %v495_v18 }
 0x2e5   : > { %937 = vpow2.f32 %v496_v19 }
 0x2f2   : > { %v938_v20 = vpop.eup %937 }
 0x2f3   : > { %835 = vmatmul.mubr.msk.f32.vlgmr.msra.gmra.mxu1 %vm492_vm2, %v938_v20  ;;  %v498_v21 = vsel %vm492_vm2, %v938_v20, 0.0 }
 0x2f4   : > { %499 = vadd.xlane.f32.xlu1 %v498_v21 }
 0x37d   : > { %v500_v26 = vpop.xlane.xlu1 %499 }
 0x37e   : > { %939 = vrcp.f32 %v500_v26 }
 0x38b   : > { %v940_v27 = vpop.eup %939 }
 0x3b3   : > { %v570_v28 = vpop.f32.mrf.mxu1 }
 0x3b4   : > { %v575_v29 = vmul.f32 %v940_v27, %v570_v28 }
 0x3b5   : > { %v836_v30 = vpop.f32.mrf.mxu1 }
 0x3b6   : > { %576 = vst.msk [vmem:[#allocation5] sm:$0xff] %vm326_vm1, %v575_v29 }
 0x3bd   : > { %v577_v31 = vld [vmem:[#allocation5] sm:$0xff] }
 0x3be   : > { %846 = vmatmul.mubr.msk.f32.vlgmr.msra.gmra.mxu0 %vm326_vm1, %v577_v31 }
 0x47e   : > { %v658_v33 = vpop.f32.mrf.mxu0 }
 0x47f   : > { %v659_v34 = vadd.f32 %v796_v32, %v658_v33 }
 0x480   : > { %v847_v35 = vpop.f32.mrf.mxu0 }
 0x481   : > { %662 = vst.msk [vmem:[%s309_s29] sm:$0xff] %vm326_vm1, %v659_v34 }
 0x482   : > { %1034 = shalt.err (!%p1031_p5)
}
 0x483   : > { %s1035_s30 = scalar_lea.hbm %s1326_s14, 128  ;;  %s1039_s17 = scalar_lea.hbm %s1375_s6, 256 }
 0x484   : > { %p1036_p10 = scmp.ne.s32.totalorder %s1326_s14, %s1035_s30  ;;  %p1040_p6 = scmp.lt.s32.totalorder %s1326_s14, %s1375_s6 }
 0x485   : > { %p1041_p12 = scmp.lt.s32.totalorder %s1039_s17, %s1035_s30 }
 0x486   : > { %p1037_p1 = pnand %p1036_p10, %p1247_p7 }
 0x487   : > { %p1042_p3 = por %p1041_p12, %p1040_p6 }
 0x488   : > { %p1038_p4 = pneg %p1037_p1 }
 0x48a   : > { %p1043_p8 = pnand %p1042_p3, %p1038_p4 }
 0x48c   : > { %1046 = shalt.err (!%p1043_p8)
}
 0x48d   : > { %858 = dma.vmem_to_hbm [thread:$0]  (%p1247_p7), %s679_s5, 128, %s1326_s14, %s664_s16  }
 0x48e PF: > { %s690_s20 = sand.u32 1, %s1085_s21   ;;  %p1391_p9 = scmp.ne.s32.totalorder %s1383_s7, 0 }
 0x48f   : > { %p1392_p11 = scmp.ge.s32.totalorder %s1105_s26, 2  ;;  %s691_s29 = scalar_lea.sflag [#allocation8], %s690_s20 }
 0x491   : > { %p872_p2 = pnand %p1392_p11, %p1391_p9 }
 0x493   : > { %p873_p13 = pneg %p872_p2 }
 0x495   : > { %1080 = dma.done.wait (%p873_p13), %s691_s29, 128  }
 0x496   : > { %1082 = vsyncadd (%p873_p13), %s691_s29, 4294967168  ;;  %s23_s26 = sadd.s32 1, %s1105_s26   ;;  %s1393_s21 = smov %s1089_s22 }
 0x497   : > { %p20_p0 = scmp.ge.s32.totalorder %s23_s26, 4   ;;  %s1394_s22 = smov %s1093_s23 }
 0x498   : > { %s1395_s23 = smov %s1256_s15  ;;  %s1396_s24 = smov %s1101_s25 }
 0x499   : > { %s1397_s25 = smov %s1399_s27  ;;  %22 = sbr.rel (!%p20_p0) target bundleno = 9 (0x9), region = 102 }
 0x49e   :  { %696 = vsyncpa [#allocation7], 1 }
 0x49f   :  { %698 = vsyncpa [#allocation7 + $0x1], 1 }
 0x4a0   :  { %699 = vsyncpa [#allocation10], 1 }
 0x4a1   :  { %700 = vsyncpa [#allocation8], 1 }
 0x4a2   :  { %702 = vsyncpa [#allocation8 + $0x1], 1 }

</bundles_post_ra>
